<compile_context>
chip_gen: v5e
topology: v5e:2x2
jax: 0.10.0
libtpu: 0.0.40
codegen_flags: <defaults>
</compile_context>

<pallas_src>
import functools

import jax
import jax.numpy as jnp
from jax.experimental import pallas as pl
from jax.experimental.pallas import tpu as pltpu


def _round_up(v, m):
    return ((v + m - 1) // m) * m


def _gin_kernel(idx_ref, x_ref, w_ref, b_ref, scale_ref, o_ref, *, fold_self):
    # idx_ref:   (tm, K)          int32   neighbor indices for this row tile
    # x_ref:     (N_pad, Cin_p)   f32/bf16  all node features for this batch (resident)
    # w_ref:     (Cin_p, Cout_p)  f32/bf16  1x1-conv weight as a dense matrix
    # b_ref:     (1, Cout_p)      f32     conv bias
    # scale_ref: (1,)             f32     (1 + eps)   -- SMEM scalar
    # o_ref:     (tm, Cout_p)     f32
    tm, k = idx_ref.shape
    n = x_ref.shape[0]

    idx = idx_ref[...]                                        # (tm, K)
    col = jax.lax.broadcasted_iota(jnp.int32, (tm, n), 1)     # lane ids

    # Row tile of the neighbor-count matrix: acc[r, m] = #{kk : idx[r, kk] == m}.
    # K is small & static -> unrolled VPU compares feeding the MXU.
    acc = jnp.zeros((tm, n), jnp.float32)
    for kk in range(k):
        acc = acc + (idx[:, kk:kk + 1] == col).astype(jnp.float32)

    scale = scale_ref[0]                                      # (1 + eps), f32 scalar
    row0 = pl.multiple_of(pl.program_id(1) * tm, tm)          # global row of this tile

    if fold_self:
        # Fold (1+eps)*x[r] into the adjacency diagonal: A'[r, row0+r] += 1+eps.
        row_ids = row0 + jax.lax.broadcasted_iota(jnp.int32, (tm, n), 0)
        acc = acc + jnp.where(col == row_ids, scale, 0.0)
        # h = A' @ X   (MXU, f32 accumulate)
        h = jnp.dot(acc.astype(x_ref.dtype), x_ref[...],
                    preferred_element_type=jnp.float32)       # (tm, Cin_p)
    else:
        # bf16-safe path: keep the self term in f32 so eps is not rounded away.
        agg = jnp.dot(acc.astype(x_ref.dtype), x_ref[...],
                      preferred_element_type=jnp.float32)     # (tm, Cin_p)
        x_tile = x_ref[pl.ds(row0, tm), :]                    # this tile's own features
        h = scale * x_tile.astype(jnp.float32) + agg

    # 1x1 conv == channel matmul (lane-dense, padded Cout) + bias + ReLU.
    y = jnp.dot(h.astype(w_ref.dtype), w_ref[...],
                preferred_element_type=jnp.float32) + b_ref[...]
    o_ref[...] = jnp.maximum(y, 0.0).astype(o_ref.dtype)


def gin_conv2d_pallas(x_nchw, edge_index, weight, bias, eps,
                      *, tile_rows=128, compute_dtype=jnp.float32):
    """x_nchw: (B, Cin, N, 1); edge_index: (2, B, N, K) int; weight: (Cout, Cin);
       bias: (Cout,); eps: scalar.  Returns (B, Cout, N, 1) f32."""
    B, Cin, N, _ = x_nchw.shape
    K = edge_index.shape[-1]
    Cout = weight.shape[0]

    # ---- layout / padding (wrapper) ----
    x_bnc = jnp.transpose(x_nchw[..., 0], (0, 2, 1))                   # (B, N, Cin)
    idx = edge_index[0].astype(jnp.int32)                              # (B, N, K)

    Cin_p = _round_up(Cin, 128)                                        # lane-dense channels
    Cout_p = _round_up(Cout, 128)

    N8 = _round_up(N, 8)
    tm = min(tile_rows, N8)                                            # node-tile rows
    N_pad = _round_up(N8, tm)
    n_tiles = N_pad // tm

    x_p = jnp.pad(x_bnc, ((0, 0), (0, N_pad - N), (0, Cin_p - Cin))
                  ).astype(compute_dtype)                              # (B, N_pad, Cin_p)
    idx_p = jnp.pad(idx, ((0, 0), (0, N_pad - N), (0, 0)))             # padded rows -> node 0
    w_p = jnp.pad(jnp.transpose(weight, (1, 0)).astype(jnp.float32),
                  ((0, Cin_p - Cin), (0, Cout_p - Cout))).astype(compute_dtype)
    b_p = jnp.pad(bias.astype(jnp.float32), (0, Cout_p - Cout)).reshape(1, Cout_p)
    scale = (1.0 + jnp.asarray(eps, jnp.float32)).reshape(1)           # SMEM scalar

    # Only fold the (1+eps) self term into the adjacency when the matmul runs
    # in f32 (exact); in bf16 the count+eps sum could round eps away.
    fold_self = (jnp.dtype(compute_dtype) == jnp.dtype(jnp.float32))

    # ---- explicit VMEM budget (v7x has only 64 MiB physical) ----
    itemsize = jnp.dtype(compute_dtype).itemsize
    est = (2 * (N_pad * Cin_p * itemsize)        # resident X (double-buffered across b)
           + 2 * (tm * K * 4)                    # idx tiles
           + 2 * (tm * Cout_p * 4)               # out tiles
           + Cin_p * Cout_p * itemsize + Cout_p * 4
           + 2 * (tm * N_pad * 4)                # adjacency row tile + staging
           + (4 << 20))                          # headroom
    vmem_limit = int(min(max(est, 16 << 20), 56 << 20))

    out = pl.pallas_call(
        functools.partial(_gin_kernel, fold_self=fold_self),
        out_shape=jax.ShapeDtypeStruct((B, N_pad, Cout_p), jnp.float32),
        grid=(B, n_tiles),
        in_specs=[
            pl.BlockSpec((None, tm, K), lambda b, i: (b, i, 0)),         # idx row tile
            pl.BlockSpec((None, N_pad, Cin_p), lambda b, i: (b, 0, 0)),  # full X (resident per b)
            pl.BlockSpec((Cin_p, Cout_p), lambda b, i: (0, 0)),          # weight
            pl.BlockSpec((1, Cout_p), lambda b, i: (0, 0)),              # bias
            pl.BlockSpec(memory_space=pltpu.MemorySpace.SMEM),           # (1+eps) scalar
        ],
        out_specs=pl.BlockSpec((None, tm, Cout_p), lambda b, i: (b, i, 0)),
        compiler_params=pltpu.CompilerParams(
            dimension_semantics=("parallel", "parallel"),
            vmem_limit_bytes=vmem_limit),
    )(idx_p, x_p, w_p, b_p, scale)

    out = out[:, :N, :Cout]                                            # drop padding
    return jnp.transpose(out, (0, 2, 1))[..., None]                    # (B, Cout, N, 1)


def gin_conv2d_ref(x_nchw, edge_index, weight, bias, eps):
    """Pure-JAX reference mirroring the PyTorch forward."""
    idx = edge_index[0]                                                # (B, N, K)
    x_bnc = jnp.transpose(x_nchw[..., 0], (0, 2, 1))                   # (B, N, Cin)
    x_j = jax.vmap(lambda xb, ib: xb[ib])(x_bnc, idx)                  # (B, N, K, Cin)
    agg = x_j.sum(axis=2)                                              # (B, N, Cin)
    h = (1.0 + eps) * x_bnc + agg
    y = jnp.einsum("bnc,oc->bno", h, weight) + bias[None, None, :]
    y = jnp.maximum(y, 0.0)
    return jnp.transpose(y, (0, 2, 1))[..., None]                      # (B, Cout, N, 1)


if __name__ == "__main__":
    key = jax.random.PRNGKey(0)
    B, Cin, Cout, N, K = 2, 4, 8, 16, 8

    k1, k2, k3, k4 = jax.random.split(key, 4)
    x = jax.random.normal(k1, (B, Cin, N, 1), dtype=jnp.float32)
    edge_index = jax.random.randint(k2, (2, B, N, K), 0, N, dtype=jnp.int32)

    # Conv2d(in, out, 1, bias=True) parameters (1x1 kernel dims squeezed).
    weight = jax.random.normal(k3, (Cout, Cin), dtype=jnp.float32) * 0.1
    bias = jax.random.normal(k4, (Cout,), dtype=jnp.float32) * 0.1
    eps = 0.0  # eps_init = 0.0 as in the module __init__

    out = gin_conv2d_pallas(x, edge_index, weight, bias, eps)
    out = jax.block_until_ready(out)

    ref = gin_conv2d_ref(x, edge_index, weight, bias, eps)
    assert out.shape == (B, Cout, N, 1)
    assert jnp.allclose(out, ref, atol=1e-5, rtol=1e-5), "mismatch vs reference"

    print("KERNEL_OK")
</pallas_src>

<mosaic_0001>
module attributes {stable_mosaic.version = 11 : i64} {
  func.func @_gin_kernel(%arg0: i32, %arg1: i32, %arg2: memref<1x16x8xi32, #tpu.memory_space<vmem>>, %arg3: memref<1x16x128xf32, #tpu.memory_space<vmem>>, %arg4: memref<128x128xf32, #tpu.memory_space<vmem>>, %arg5: memref<1x128xf32, #tpu.memory_space<vmem>>, %arg6: memref<1xf32, #tpu.memory_space<smem>>, %arg7: memref<1x16x128xf32, #tpu.memory_space<vmem>>) attributes {dimension_semantics = [#tpu.dimension_semantics<parallel>, #tpu.dimension_semantics<parallel>], iteration_bounds = array<i64: 2, 1>, scalar_prefetch = 0 : i64, scratch_operands = 0 : i64, tpu.core_type = #tpu.core_type<tc>, window_params = [{transform_indices = @transform_0, window_bounds = array<i64: 1, 16, 8>}, {transform_indices = @transform_1, window_bounds = array<i64: 1, 16, 128>}, {pipeline_mode = #tpu.pipeline_mode<synchronous>, transform_indices = @transform_2, window_bounds = array<i64: 128, 128>}, {pipeline_mode = #tpu.pipeline_mode<synchronous>, transform_indices = @transform_3, window_bounds = array<i64: 1, 128>}, {transform_indices = @transform_4, window_bounds = array<i64: 1>}, {transform_indices = @transform_5, window_bounds = array<i64: 1, 16, 128>}]} {
    %c0 = arith.constant 0 : index
    %c0_0 = arith.constant 0 : index
    %c0_1 = arith.constant 0 : index
    %0 = vector.load %arg2[%c0, %c0_0, %c0_1] : memref<1x16x8xi32, #tpu.memory_space<vmem>>, vector<1x16x8xi32>
    %1 = vector.shape_cast %0 : vector<1x16x8xi32> to vector<16x8xi32>
    %2 = tpu.iota {dimensions = array<i32: 1>} : vector<16x16xi32>
    %cst = arith.constant 0.000000e+00 : f32
    %3 = vector.broadcast %cst : f32 to vector<16x16xf32>
    %4 = vector.extract_strided_slice %1 {offsets = [0, 0], sizes = [16, 1], strides = [1, 1]} : vector<16x8xi32> to vector<16x1xi32>
    %5 = vector.broadcast %4 : vector<16x1xi32> to vector<16x16xi32>
    %6 = arith.cmpi eq, %5, %2 : vector<16x16xi32>
    %7 = arith.extui %6 : vector<16x16xi1> to vector<16x16xi32>
    %8 = arith.sitofp %7 : vector<16x16xi32> to vector<16x16xf32>
    %9 = arith.addf %3, %8 : vector<16x16xf32>
    %10 = vector.extract_strided_slice %1 {offsets = [0, 1], sizes = [16, 1], strides = [1, 1]} : vector<16x8xi32> to vector<16x1xi32>
    %11 = vector.broadcast %10 : vector<16x1xi32> to vector<16x16xi32>
    %12 = arith.cmpi eq, %11, %2 : vector<16x16xi32>
    %13 = arith.extui %12 : vector<16x16xi1> to vector<16x16xi32>
    %14 = arith.sitofp %13 : vector<16x16xi32> to vector<16x16xf32>
    %15 = arith.addf %9, %14 : vector<16x16xf32>
    %16 = vector.extract_strided_slice %1 {offsets = [0, 2], sizes = [16, 1], strides = [1, 1]} : vector<16x8xi32> to vector<16x1xi32>
    %17 = vector.broadcast %16 : vector<16x1xi32> to vector<16x16xi32>
    %18 = arith.cmpi eq, %17, %2 : vector<16x16xi32>
    %19 = arith.extui %18 : vector<16x16xi1> to vector<16x16xi32>
    %20 = arith.sitofp %19 : vector<16x16xi32> to vector<16x16xf32>
    %21 = arith.addf %15, %20 : vector<16x16xf32>
    %22 = vector.extract_strided_slice %1 {offsets = [0, 3], sizes = [16, 1], strides = [1, 1]} : vector<16x8xi32> to vector<16x1xi32>
    %23 = vector.broadcast %22 : vector<16x1xi32> to vector<16x16xi32>
    %24 = arith.cmpi eq, %23, %2 : vector<16x16xi32>
    %25 = arith.extui %24 : vector<16x16xi1> to vector<16x16xi32>
    %26 = arith.sitofp %25 : vector<16x16xi32> to vector<16x16xf32>
    %27 = arith.addf %21, %26 : vector<16x16xf32>
    %28 = vector.extract_strided_slice %1 {offsets = [0, 4], sizes = [16, 1], strides = [1, 1]} : vector<16x8xi32> to vector<16x1xi32>
    %29 = vector.broadcast %28 : vector<16x1xi32> to vector<16x16xi32>
    %30 = arith.cmpi eq, %29, %2 : vector<16x16xi32>
    %31 = arith.extui %30 : vector<16x16xi1> to vector<16x16xi32>
    %32 = arith.sitofp %31 : vector<16x16xi32> to vector<16x16xf32>
    %33 = arith.addf %27, %32 : vector<16x16xf32>
    %34 = vector.extract_strided_slice %1 {offsets = [0, 5], sizes = [16, 1], strides = [1, 1]} : vector<16x8xi32> to vector<16x1xi32>
    %35 = vector.broadcast %34 : vector<16x1xi32> to vector<16x16xi32>
    %36 = arith.cmpi eq, %35, %2 : vector<16x16xi32>
    %37 = arith.extui %36 : vector<16x16xi1> to vector<16x16xi32>
    %38 = arith.sitofp %37 : vector<16x16xi32> to vector<16x16xf32>
    %39 = arith.addf %33, %38 : vector<16x16xf32>
    %40 = vector.extract_strided_slice %1 {offsets = [0, 6], sizes = [16, 1], strides = [1, 1]} : vector<16x8xi32> to vector<16x1xi32>
    %41 = vector.broadcast %40 : vector<16x1xi32> to vector<16x16xi32>
    %42 = arith.cmpi eq, %41, %2 : vector<16x16xi32>
    %43 = arith.extui %42 : vector<16x16xi1> to vector<16x16xi32>
    %44 = arith.sitofp %43 : vector<16x16xi32> to vector<16x16xf32>
    %45 = arith.addf %39, %44 : vector<16x16xf32>
    %46 = vector.extract_strided_slice %1 {offsets = [0, 7], sizes = [16, 1], strides = [1, 1]} : vector<16x8xi32> to vector<16x1xi32>
    %47 = vector.broadcast %46 : vector<16x1xi32> to vector<16x16xi32>
    %48 = arith.cmpi eq, %47, %2 : vector<16x16xi32>
    %49 = arith.extui %48 : vector<16x16xi1> to vector<16x16xi32>
    %50 = arith.sitofp %49 : vector<16x16xi32> to vector<16x16xf32>
    %51 = arith.addf %45, %50 : vector<16x16xf32>
    %c0_2 = arith.constant 0 : index
    %52 = memref.load %arg6[%c0_2] : memref<1xf32, #tpu.memory_space<smem>>
    %c16_i32 = arith.constant 16 : i32
    %53 = arith.muli %arg1, %c16_i32 : i32
    %54 = tpu.assume_multiple %53, 16 : i32
    %55 = tpu.iota {dimensions = array<i32: 0>} : vector<16x16xi32>
    %56 = vector.broadcast %54 : i32 to vector<16x16xi32>
    %57 = arith.addi %56, %55 : vector<16x16xi32>
    %58 = arith.cmpi eq, %2, %57 : vector<16x16xi32>
    %cst_3 = arith.constant 0.000000e+00 : f32
    %59 = vector.broadcast %52 : f32 to vector<16x16xf32>
    %60 = vector.broadcast %cst_3 : f32 to vector<16x16xf32>
    %61 = arith.select %58, %59, %60 : vector<16x16xi1>, vector<16x16xf32>
    %62 = arith.addf %51, %61 : vector<16x16xf32>
    %c0_4 = arith.constant 0 : index
    %c0_5 = arith.constant 0 : index
    %c0_6 = arith.constant 0 : index
    %63 = vector.load %arg3[%c0_4, %c0_5, %c0_6] : memref<1x16x128xf32, #tpu.memory_space<vmem>>, vector<1x16x128xf32>
    %64 = vector.shape_cast %63 : vector<1x16x128xf32> to vector<16x128xf32>
    %cst_7 = arith.constant dense<0.000000e+00> : vector<16x128xf32>
    %65 = tpu.matmul %62, %64, %cst_7 {dimension_numbers = #tpu.dot_dimension_numbers<[1], [0], [0], [1], [0, 0, 1, 1], [], []>} : vector<16x16xf32>, vector<16x128xf32>, vector<16x128xf32> -> vector<16x128xf32>
    %c0_8 = arith.constant 0 : index
    %c0_9 = arith.constant 0 : index
    %66 = vector.load %arg4[%c0_8, %c0_9] : memref<128x128xf32, #tpu.memory_space<vmem>>, vector<128x128xf32>
    %cst_10 = arith.constant dense<0.000000e+00> : vector<16x128xf32>
    %67 = tpu.matmul %65, %66, %cst_10 {dimension_numbers = #tpu.dot_dimension_numbers<[1], [0], [0], [1], [0, 0, 1, 1], [], []>} : vector<16x128xf32>, vector<128x128xf32>, vector<16x128xf32> -> vector<16x128xf32>
    %c0_11 = arith.constant 0 : index
    %c0_12 = arith.constant 0 : index
    %68 = vector.load %arg5[%c0_11, %c0_12] : memref<1x128xf32, #tpu.memory_space<vmem>>, vector<1x128xf32>
    %69 = vector.broadcast %68 : vector<1x128xf32> to vector<16x128xf32>
    %70 = arith.addf %67, %69 : vector<16x128xf32>
    %cst_13 = arith.constant 0.000000e+00 : f32
    %71 = vector.broadcast %cst_13 : f32 to vector<16x128xf32>
    %72 = arith.maximumf %70, %71 : vector<16x128xf32>
    %c0_14 = arith.constant 0 : index
    %c0_15 = arith.constant 0 : index
    %c0_16 = arith.constant 0 : index
    %73 = vector.load %arg7[%c0_14, %c0_15, %c0_16] : memref<1x16x128xf32, #tpu.memory_space<vmem>>, vector<1x16x128xf32>
    %74 = vector.shape_cast %73 : vector<1x16x128xf32> to vector<16x128xf32>
    %75 = vector.shape_cast %72 : vector<16x128xf32> to vector<1x16x128xf32>
    tpu.vector_store %arg7[%c0_14, %c0_15, %c0_16], %75 {strides = array<i32>} : memref<1x16x128xf32, #tpu.memory_space<vmem>>, vector<1x16x128xf32>,
    return
  }
  func.func @transform_0(%arg0: i32, %arg1: i32) -> (i32, i32, i32) {
    %c0_i32 = arith.constant 0 : i32
    %c0_i32_0 = arith.constant 0 : i32
    return %arg0, %arg1, %c0_i32 : i32, i32, i32
  }
  func.func @transform_1(%arg0: i32, %arg1: i32) -> (i32, i32, i32) {
    %c0_i32 = arith.constant 0 : i32
    %c0_i32_0 = arith.constant 0 : i32
    %c0_i32_1 = arith.constant 0 : i32
    return %arg0, %c0_i32, %c0_i32_0 : i32, i32, i32
  }
  func.func @transform_2(%arg0: i32, %arg1: i32) -> (i32, i32) {
    %c0_i32 = arith.constant 0 : i32
    %c0_i32_0 = arith.constant 0 : i32
    %c0_i32_1 = arith.constant 0 : i32
    return %c0_i32, %c0_i32_0 : i32, i32
  }
  func.func @transform_3(%arg0: i32, %arg1: i32) -> (i32, i32) {
    %c0_i32 = arith.constant 0 : i32
    %c0_i32_0 = arith.constant 0 : i32
    %c0_i32_1 = arith.constant 0 : i32
    return %c0_i32, %c0_i32_0 : i32, i32
  }
  func.func @transform_4(%arg0: i32, %arg1: i32) -> i32 {
    %c0_i32 = arith.constant 0 : i32
    %c0_i32_0 = arith.constant 0 : i32
    return %c0_i32 : i32
  }
  func.func @transform_5(%arg0: i32, %arg1: i32) -> (i32, i32, i32) {
    %c0_i32 = arith.constant 0 : i32
    %c0_i32_0 = arith.constant 0 : i32
    return %arg0, %arg1, %c0_i32 : i32, i32, i32
  }
}

</mosaic_0001>

<bundles_post_ra>
// kernel: tpu_custom_call.1
= control target key start
LH: loop header
LB: loop body
LE: loop exit
PB: predicated region body
PF: predicated region fallthrough
CT: control target
= control target key end

     0   :  { %s1089_s0 = inlined_call_operand.vmem [shape: s32[2,16,8], index: 0, kind: input, shape index: {}]   ;;  %s1090_s1 = inlined_call_operand.vmem [shape: f32[2,16,128], index: 1, kind: input, shape index: {}]   ;;  %s1091_s2 = inlined_call_operand.hbm [shape: f32[128,128], index: 2, kind: input, shape index: {}]   ;;  %s1092_s3 = inlined_call_operand.vmem [shape: f32[1,128], index: 3, kind: input, shape index: {}]   ;;  %s1093_s4 = inlined_call_operand.<no memory space> [shape: f32[1], index: 4, kind: input, shape index: {}]   ;;  %s1094_s5 = inlined_call_operand.hbm [shape: f32[2,16,128], index: 5, kind: output, shape index: {}]  }
   0x1   :  { %10 = sst [smem:[#allocation2]] %s1093_s4 }
   0x2   :  { %11 = vsyncpa [#allocation4], 0 }
   0x3   :  { %12 = vsyncpa [#allocation5], 0 }
   0x4   :  { %14 = vsyncpa [#allocation5 + $0x1], 0  ;;  %s935_s20 = smov 0   ;;  %s937_s21 = smov 0  }
   0x5   :  { %s939_s22 = smov 0   ;;  %s941_s23 = smov 0  }
   0x6   :  { %s943_s24 = smov 0   ;;  %s945_s25 = smov 0  }
   0x7 LB: > { %s623_s4 = sadd.s32 4294967295, %s886_s25   ;;  %s624_s26 = sadd.s32 4294967294, %s886_s25   ;;  %s886_s25 = sphi %s945_s25, %s20_s25   ;;  %s882_s24 = sphi %s943_s24, %s1101_s24   ;;  %s878_s23 = sphi %s941_s23, %s1100_s23   ;;  %s874_s22 = sphi %s939_s22, %s1099_s22   ;;  %s870_s21 = sphi %s937_s21, %s1098_s21   ;;  %s866_s20 = sphi %s935_s20, %s1097_s20  }
   0x8   : > { %s32_s27 = sadd.s32 1, %s882_s24  ;;  %s158_s28 = sadd.s32 1, %s874_s22 }
   0x9   : > { %p34_p0 = scmp.ge.s32.totalorder %s32_s27, 2  ;;  %p168_p1 = scmp.ne.s32.totalorder %s874_s22, %s870_s21 }
   0xa   : > { %p169_p2 = scmp.eq.s32.totalorder %s623_s4, 1  ;;  %p174_p3 = scmp.ne.s32.totalorder %s870_s21, %s866_s20 }
   0xb   : > { %s1103_s27 = smov (%p34_p0, %s32_s27), 0  ;;  %p175_p5 = scmp.eq.s32.totalorder %s624_s26, 1 }
   0xc   : > { %p975_p4 = por %p169_p2, %p168_p1  ;;  %s153_s30 = ssub.s32 %s882_s24, %s1103_s27 }
   0xd   : > { %p625_p6 = scmp.ge.s32.totalorder %s886_s25, 1  ;;  %p156_p7 = scmp.eq.s32.totalorder %s153_s30, 0 }
   0xe   : > { %p982_p8 = por %p175_p5, %p174_p3  ;;  %p182_p9 = scmp.lt.s32.totalorder %s886_s25, 3 }
   0xf   : > { %s988_s7 = scalar_select %p156_p7, %s874_s22, %s158_s28  }
  0x10   : > { %p183_p10 = pnand %p625_p6, %p182_p9  ;;  %p691_p11 = scmp.eq.s32.totalorder %s623_s4, 0 }
  0x11   : > { %s193_s10 = sshll.u32 %s1091_s2, 4  ;;  %s888_s11 = smov [#allocation3]   ;;  %s194_s10 = int_to_ptr.hbm [resolvable:$true] %s193_s10 }
  0x12   : > { %p683_p12 = pneg %p183_p10  ;;  %s195_s12 = sshll.u32 %s888_s11, 4  ;;  %s196_s12 = int_to_ptr.vmem [resolvable:$true] %s195_s12 }
  0x13   : > { %s889_s13 = smov 128   ;;  %s890_s14 = smov 8  }
  0x14   : > { %p684_p13 = pnand %p691_p11, %p683_p12  ;;  %238 = sbr.rel (%p183_p10) target bundleno = 467 (0x1d3), region = 40 }
  0x16   : > { %686 = dma.hbm_to_vmem [thread:$0]  (!%p684_p13), %s194_s10, 2048, %s196_s12, [#allocation4], %s889_s13, %s889_s13, %s890_s14  }
  0x19   : > { %857 = dma.done.wait (%p691_p11), [#allocation4], 2048  }
  0x1a   : > { %859 = vsyncadd (%p691_p11), [#allocation4], 4294965248  ;;  %p277_p0 = scmp.lt.s32.totalorder %s878_s23, 1  ;;  %v891_v0 = vmov 2   ;;  %v892_v1 = vmov 0   ;;  %v893_v2 = vmov 4   ;;  %v294_v14 = vlaneseq }
  0x1b   : > { %758 = vset.pattern.permute.xlu1 %v891_v0  ;;  %756 = vset.pattern.permute.xlu0 %v892_v1  ;;  %v894_v4 = vmov 3   ;;  %v895_v5 = vmov 1   ;;  %v896_v7 = vmov 5   ;;  %v897_v8 = vmov 6   ;;  %v470_v27 = vld [vmem:[#allocation3 + $0x78] sm:$0xff]  ;;  %v469_v28 = vld [vmem:[#allocation3 + $0x70] sm:$0xff] }
  0x1c   : > { %s995_s15 = scalar_select %p277_p0, %s878_s23, 1  ;;  %760 = vset.pattern.permute.xlu2 %v893_v2  ;;  %v898_v9 = vmov 7   ;;  %v1008_v19 = vand.u32 127, %v294_v14  ;;  %v899_v21 = vmov 0.0   ;;  %475 = vmatpush.msra.mxu1 %v470_v27  ;;  %v468_v31 = vld [vmem:[#allocation3 + $0x68] sm:$0xff]  ;;  %v467_v34 = vld [vmem:[#allocation3 + $0x60] sm:$0xff] }
  0x1d   : > { %661 = vmatpush.msra.mxu2 %v470_v27  ;;  %s1022_s30 = sld [smem:[#allocation2]]  ;;  %v466_v38 = vld [vmem:[#allocation3 + $0x58] sm:$0xff]  ;;  %v465_v42 = vld [vmem:[#allocation3 + $0x50] sm:$0xff]  ;;  %v411_v45 = vshrl.u32 %v294_v14, 7  ;;  %v464_v47 = vld [vmem:[#allocation3 + $0x48] sm:$0xff]  ;;  %vm425_vm15 = vcmask 130048  }
  0x1e   : > { %s658_s16 = sshll.u32 %s995_s15, 4  ;;  %476 = vmatpush.msra.mxu1 %v469_v28  ;;  %v463_v51 = vld [vmem:[#allocation3 + $0x40] sm:$0xff]  ;;  %v462_v56 = vld [vmem:[#allocation3 + $0x38] sm:$0xff]  ;;  %v461_v62 = vld [vmem:[#allocation3 + $0x30] sm:$0xff]  ;;  %s273_s8 = sand.u32 1, %s870_s21  }
  0x1f   : > { %s284_s19 = scalar_lea.vmem %s1089_s0, %s658_s16  ;;  %s290_s28 = scalar_lea.vmem %s1090_s1, %s658_s16  ;;  %662 = vmatpush.msra.mxu2 %v469_v28  ;;  %vm416_vm11 = vcmp.eq.s32.totalorder %v1008_v19, %v411_v45 }
  0x20   : > { %v292_v3 = vld [vmem:[%s284_s19] sm:$0xff]  ;;  %v293_v6 = vld [vmem:[%s284_s19 + $0x8] sm:$0xff]  ;;  %477 = vmatpush.msra.mxu1 %v468_v31  ;;  %s630_s11 = sshll.u32 %s273_s8, 4  ;;  %s660_s13 = sshll.u32 %s878_s23, 4 }
  0x21   : > { %325 = vperm.xlu1 %758, %v292_v3   ;;  %297 = vperm.xlu0 %756, %v292_v3   ;;  %v424_v15 = vld [vmem:[%s290_s28 + $0x8] sm:$0xff]  ;;  %v423_v16 = vld [vmem:[%s290_s28] sm:$0xff]  ;;  %s275_s12 = scalar_lea.vmem [#allocation6], %s630_s11  ;;  %s516_s16 = scalar_lea.hbm %s1094_s5, %s660_s13 }
  0x22   : > { %353 = vperm.xlu2 %760, %v292_v3   ;;  %446 = vmatpush.msra.mxu0 %v424_v15  ;;  %v456_v15 = vld [vmem:[#allocation3 + $0x8] sm:$0xff]  ;;  %s517_s17 = sshll.u32 %s275_s12, 4  ;;  %s519_s18 = sshll.u32 %s516_s16, 4  ;;  %s518_s17 = int_to_ptr.vmem [resolvable:$true] %s517_s17  ;;  %s520_s18 = int_to_ptr.hbm [resolvable:$true] %s519_s18 }
  0x23   : > { %663 = vmatpush.msra.mxu2 %v468_v31  ;;  %478 = vmatpush.msra.mxu1 %v467_v34  ;;  %v418_v54 = vstv %s1022_s30  ;;  %s503_s19 = scalar_lea.sflag [#allocation5], %s273_s8  ;;  %s818_s4 = sshra.s32 %s520_s18, 4  ;;  %s819_s4 = int_to_ptr.hbm [resolvable:$true] %s818_s4 }
  0x24   : > { %447 = vmatpush.msra.mxu0 %v423_v16  ;;  %v419_v61 = vsel %vm416_vm11, %v418_v54, 0.0  ;;  %s820_s26 = scalar_lea.hbm %s819_s4, 16  ;;  %s824_s30 = scalar_lea.hbm %s1094_s5, 32 }
  0x25   : > { %664 = vmatpush.msra.mxu2 %v467_v34  ;;  %479 = vmatpush.msra.mxu1 %v466_v38  ;;  %p821_p1 = scmp.ne.s32.totalorder %s819_s4, %s820_s26  ;;  %p825_p5 = scmp.lt.s32.totalorder %s819_s4, %s1094_s5 }
  0x26   : > { %p826_p6 = scmp.lt.s32.totalorder %s824_s30, %s820_s26 }
  0x27   : > { %665 = vmatpush.msra.mxu2 %v466_v38  ;;  %480 = vmatpush.msra.mxu1 %v465_v42  ;;  %p822_p2 = pnand %p821_p1, %p975_p4 }
  0x28   : > { %p827_p7 = por %p826_p6, %p825_p5 }
  0x29   : > { %759 = vset.pattern.permute.xlu1 %v894_v4  ;;  %757 = vset.pattern.permute.xlu0 %v895_v5  ;;  %p823_p3 = pneg %p822_p2 }
  0x2a   : > { %339 = vperm.xlu1 %759, %v292_v3   ;;  %311 = vperm.xlu0 %757, %v292_v3  }
  0x2b   : > { %761 = vset.pattern.permute.xlu2 %v892_v1  ;;  %666 = vmatpush.msra.mxu2 %v465_v42  ;;  %v460_v1 = vld [vmem:[#allocation3 + $0x28] sm:$0xff]  ;;  %p828_p9 = pnand %p827_p7, %p823_p3 }
  0x2c   : > { %300 = vperm.xlu2 %761, %v293_v6   ;;  %481 = vmatpush.msra.mxu1 %v464_v47 }
  0x2d   : > { %667 = vmatpush.msra.mxu2 %v464_v47 }
  0x2e   : > { %482 = vmatpush.msra.mxu1 %v463_v51 }
  0x2f   : > { %668 = vmatpush.msra.mxu2 %v463_v51 }
  0x30   : > { %483 = vmatpush.msra.mxu1 %v462_v56 }
  0x31   : > { %669 = vmatpush.msra.mxu2 %v462_v56 }
  0x32   : > { %762 = vset.pattern.permute.xlu1 %v895_v5  ;;  %764 = vset.pattern.permute.xlu0 %v891_v0  ;;  %v412_v5 = vadd.s32 8, %v411_v45 }
  0x33   : > { %314 = vperm.xlu1 %762, %v293_v6   ;;  %328 = vperm.xlu0 %764, %v293_v6  }
  0x34   : > { %763 = vset.pattern.permute.xlu2 %v896_v7  ;;  %484 = vmatpush.msra.mxu1 %v461_v62 }
  0x35   : > { %367 = vperm.xlu2 %763, %v292_v3   ;;  %670 = vmatpush.msra.mxu2 %v461_v62 }
  0x36   : > { %485 = vmatpush.msra.mxu1 %v460_v1 }
  0x37   : > { %671 = vmatpush.msra.mxu2 %v460_v1 }
  0x3b   : > { %765 = vset.pattern.permute.xlu1 %v897_v8  ;;  %769 = vset.pattern.permute.xlu0 %v896_v7 }
  0x3c   : > { %381 = vperm.xlu1 %765, %v292_v3   ;;  %370 = vperm.xlu0 %769, %v293_v6  }
  0x3d   : > { %766 = vset.pattern.permute.xlu2 %v894_v4 }
  0x3e   : > { %342 = vperm.xlu2 %766, %v293_v6  }
  0x44   : > { %767 = vset.pattern.permute.xlu1 %v898_v9  ;;  %772 = vset.pattern.permute.xlu0 %v898_v9 }
  0x45   : > { %395 = vperm.xlu1 %767, %v292_v3  }
  0x46   : > { %768 = vset.pattern.permute.xlu2 %v893_v2 }
  0x47   : > { %356 = vperm.xlu2 %768, %v293_v6  }
  0x4d   : > { %770 = vset.pattern.permute.xlu1 %v897_v8  ;;  %v458_v8 = vld [vmem:[#allocation3 + $0x18] sm:$0xff] }
  0x4e   : > { %384 = vperm.xlu1 %770, %v293_v6  }
  0x4f   : > { %771 = vset.pattern.permute.xlu2 %v898_v9 }
  0x50   : > { %398 = vperm.xlu2 %771, %v293_v6   ;;  %v459_v6 = vld [vmem:[#allocation3 + $0x20] sm:$0xff] }
  0x51   : > { %486 = vmatpush.msra.mxu1 %v459_v6  ;;  %672 = vmatpush.msra.mxu2 %v459_v6 }
  0x53   : > { %487 = vmatpush.msra.mxu1 %v458_v8  ;;  %673 = vmatpush.msra.mxu2 %v458_v8 }
  0x7c   : > { %v354_v10 = vpop.permute.xlu2 %353 }
  0x7d   : > { %vm358_vm6 = vcmp.eq.s32.totalorder %v354_v10, %v1008_v19 }
  0x7e   : > { %v643_v40 = vsel %vm358_vm6, 1.0, %v899_v21 }
  0x86   : > { %v301_v13 = vpop.permute.xlu2 %300 }
  0x87   : > { %vm303_vm5 = vcmp.eq.s32.totalorder %v301_v13, %v1008_v19 }
  0x88   : > { %v636_v39 = vsel %vm303_vm5, 1.0, %v899_v21 }
  0x8f   : > { %v368_v20 = vpop.permute.xlu2 %367 }
  0x90   : > { %vm372_vm8 = vcmp.eq.s32.totalorder %v368_v20, %v1008_v19 }
  0x91   : > { %v645_v46 = vsel %vm372_vm8, 1.0, %v899_v21 }
  0x93   : > { %v326_v11 = vpop.permute.xlu1 %325  ;;  %v298_v12 = vpop.permute.xlu0 %297 }
  0x94   : > { %vm302_vm0 = vcmp.eq.s32.totalorder %v298_v12, %v1008_v19  ;;  %vm330_vm2 = vcmp.eq.s32.totalorder %v326_v11, %v1008_v19  ;;  %v457_v11 = vld [vmem:[#allocation3 + $0x10] sm:$0xff] }
  0x95   : > { %v635_v22 = vsel %vm302_vm0, 1.0, %v899_v21  ;;  %v639_v26 = vsel %vm330_vm2, 1.0, %v899_v21  ;;  %vm417_vm2 = vcmp.eq.s32.totalorder %v1008_v19, %v412_v5  ;;  %488 = vmatpush.msra.mxu1 %v457_v11  ;;  %674 = vmatpush.msra.mxu2 %v457_v11 }
  0x96   : > { %v420_v16 = vsel %vm417_vm2, %v418_v54, 0.0 }
  0x97   : > { %489 = vmatpush.msra.mxu1 %v456_v15  ;;  %675 = vmatpush.msra.mxu2 %v456_v15 }
  0x98   : > { %v343_v30 = vpop.permute.xlu2 %342 }
  0x99   : > { %vm345_vm10 = vcmp.eq.s32.totalorder %v343_v30, %v1008_v19 }
  0x9a   : > { %v642_v52 = vsel %vm345_vm10, 1.0, %v899_v21 }
  0x9c   : > { %v340_v17 = vpop.permute.xlu1 %339  ;;  %v312_v18 = vpop.permute.xlu0 %311 }
  0x9d   : > { %vm316_vm1 = vcmp.eq.s32.totalorder %v312_v18, %v1008_v19  ;;  %vm344_vm3 = vcmp.eq.s32.totalorder %v340_v17, %v1008_v19 }
  0x9e   : > { %v637_v23 = vsel %vm316_vm1, 1.0, %v899_v21  ;;  %v641_v33 = vsel %vm344_vm3, 1.0, %v899_v21 }
  0x9f   : > { %v322_v25 = vadd.f32 %v637_v23, %v635_v22  ;;  %v773_v22 = vld [vmem:[%s1092_s3] ss:$0 sm:$0xff] }
  0xa1   : > { %v336_v29 = vadd.f32 %v639_v26, %v322_v25  ;;  %v357_v48 = vpop.permute.xlu2 %356 }
  0xa2   : > { %vm359_vm12 = vcmp.eq.s32.totalorder %v357_v48, %v1008_v19 }
  0xa3   : > { %v350_v35 = vadd.f32 %v641_v33, %v336_v29  ;;  %v644_v63 = vsel %vm359_vm12, 1.0, %v899_v21 }
  0xa5   : > { %v315_v24 = vpop.permute.xlu1 %314  ;;  %v329_v32 = vpop.permute.xlu0 %328  ;;  %v364_v44 = vadd.f32 %v643_v40, %v350_v35 }
  0xa6   : > { %vm317_vm4 = vcmp.eq.s32.totalorder %v315_v24, %v1008_v19  ;;  %vm331_vm7 = vcmp.eq.s32.totalorder %v329_v32, %v1008_v19 }
  0xa7   : > { %v638_v36 = vsel %vm317_vm4, 1.0, %v899_v21  ;;  %v640_v43 = vsel %vm331_vm7, 1.0, %v899_v21  ;;  %v378_v53 = vadd.f32 %v645_v46, %v364_v44 }
  0xa8   : > { %v323_v41 = vadd.f32 %v638_v36, %v636_v39 }
  0xaa   : > { %v337_v49 = vadd.f32 %v640_v43, %v323_v41  ;;  %v399_v3 = vpop.permute.xlu2 %398 }
  0xab   : > { %vm401_vm0 = vcmp.eq.s32.totalorder %v399_v3, %v1008_v19 }
  0xac   : > { %v351_v59 = vadd.f32 %v642_v52, %v337_v49  ;;  %v650_v13 = vsel %vm401_vm0, 1.0, %v899_v21 }
  0xae   : > { %v382_v37 = vpop.permute.xlu1 %381  ;;  %v371_v58 = vpop.permute.xlu0 %370  ;;  %v365_v4 = vadd.f32 %v644_v63, %v351_v59 }
  0xaf   : > { %vm386_vm9 = vcmp.eq.s32.totalorder %v382_v37, %v1008_v19  ;;  %vm373_vm14 = vcmp.eq.s32.totalorder %v371_v58, %v1008_v19 }
  0xb0   : > { %v647_v50 = vsel %vm386_vm9, 1.0, %v899_v21  ;;  %v646_v7 = vsel %vm373_vm14, 1.0, %v899_v21 }
  0xb1   : > { %v392_v57 = vadd.f32 %v647_v50, %v378_v53  ;;  %v379_v10 = vadd.f32 %v646_v7, %v365_v4 }
  0xb7   : > { %v396_v55 = vpop.permute.xlu1 %395 }
  0xb8   : > { %vm400_vm13 = vcmp.eq.s32.totalorder %v396_v55, %v1008_v19 }
  0xb9   : > { %v649_v60 = vsel %vm400_vm13, 1.0, %v899_v21 }
  0xba   : > { %v406_v0 = vadd.f32 %v649_v60, %v392_v57 }
  0xbc   : > { %v421_v2 = vadd.f32 %v419_v61, %v406_v0 }
  0xbe   : > { %651 = vmatmul.msk.f32.vlgmr.msra.gmra.mxu0 %vm425_vm15, %v421_v2 }
  0xc0   : > { %v385_v9 = vpop.permute.xlu1 %384 }
  0xc1   : > { %vm387_vm1 = vcmp.eq.s32.totalorder %v385_v9, %v1008_v19  ;;  %v455_v19 = vld [vmem:[#allocation3] sm:$0xff] }
  0xc2   : > { %v648_v12 = vsel %vm387_vm1, 1.0, %v899_v21  ;;  %490 = vmatpush.msra.mxu1 %v455_v19  ;;  %676 = vmatpush.msra.mxu2 %v455_v19 }
  0xc3   : > { %v393_v14 = vadd.f32 %v648_v12, %v379_v10 }
  0xc5   : > { %v407_v17 = vadd.f32 %v650_v13, %v393_v14 }
  0xc7   : > { %v422_v18 = vadd.f32 %v420_v16, %v407_v17 }
  0xc9   : > { %652 = vmatmul.msk.f32.gmra.mxu0 %vm425_vm15, %v422_v18 }
 0x13b   : > { %v449_v20 = vpop.f32.mrf.mxu0 }
 0x13c   : > { %491 = vmatmul.f32.vlgmr.msra.gmra.mxu1 %v449_v20 }
 0x146   : > { %v452_v21 = vpop.f32.mrf.mxu0 }
 0x147   : > { %494 = vmatmul.f32.vlgmr.msra.gmra.mxu2 %v452_v21 }
 0x1b9   : > { %v492_v23 = vpop.f32.mrf.mxu1 }
 0x1ba   : > { %v493_v24 = vadd.f32 %v773_v22, %v492_v23 }
 0x1bc   : > { %v498_v25 = vmax.f32 %v493_v24, 0.0 }
 0x1be   : > { %500 = vst [vmem:[%s275_s12] sm:$0xff] %v498_v25 }
 0x1ca   : > { %v495_v26 = vpop.f32.mrf.mxu2 }
 0x1cb   : > { %v496_v27 = vadd.f32 %v773_v22, %v495_v26 }
 0x1cd   : > { %v499_v28 = vmax.f32 %v496_v27, 0.0 }
 0x1cf   : > { %501 = vst [vmem:[%s275_s12 + $0x8] sm:$0xff] %v499_v28 }
 0x1d0   : > { %831 = shalt.err (!%p828_p9)
}
 0x1d1   : > { %s900_s8 = smov 128   ;;  %s901_s11 = smov 8  }
 0x1d2   : > { %681 = dma.vmem_to_hbm [thread:$0]  (%p975_p4), %s518_s17, 256, %s520_s18, %s503_s19, %s900_s8, %s900_s8, %s901_s11  }
 0x1d3 PF: > { %p693_p10 = scmp.ge.s32.totalorder %s886_s25, 2  ;;  %s534_s12 = sand.u32 1, %s866_s20  }
 0x1d4   : > { %s535_s13 = scalar_lea.sflag [#allocation5], %s534_s12 }
 0x1d5   : > { %p688_p11 = pnand %p693_p10, %p982_p8 }
 0x1d7   : > { %p689_p12 = pneg %p688_p11 }
 0x1d9   : > { %861 = dma.done.wait (%p689_p12), %s535_s13, 256  }
 0x1da   : > { %863 = vsyncadd (%p689_p12), %s535_s13, 4294967040  ;;  %s20_s25 = sadd.s32 1, %s886_s25   ;;  %s1097_s20 = smov %s870_s21 }
 0x1db   : > { %p17_p13 = scmp.ge.s32.totalorder %s20_s25, 4   ;;  %s1098_s21 = smov %s874_s22 }
 0x1dc   : > { %s1099_s22 = smov %s988_s7  ;;  %s1100_s23 = smov %s882_s24 }
 0x1dd   : > { %s1101_s24 = smov %s1103_s27  ;;  %19 = sbr.rel (!%p17_p13) target bundleno = 7 (0x7), region = 83 }
 0x1e2   :  { %541 = vsyncpa [#allocation4], 1 }
 0x1e3   :  { %543 = vsyncpa [#allocation4 + $0x1], 1 }
 0x1e4   :  { %544 = vsyncpa [#allocation5], 1 }
 0x1e5   :  { %546 = vsyncpa [#allocation5 + $0x1], 1 }

</bundles_post_ra>
